<compile_context>
chip_gen: v6e
topology: v6e:2x2x1
jax: 0.10.0
libtpu: 0.0.40
codegen_flags: <defaults>
</compile_context>

<pallas_src>
import functools
import math

import jax
import jax.numpy as jnp
from jax.experimental import pallas as pl
from jax.experimental.pallas import tpu as pltpu


def _round_up(x: int, m: int) -> int:
    return ((x + m - 1) // m) * m


def _mlp_fused_kernel(*refs, num_layers: int, compute_dtype):
    """Fused MLP over one row tile.

    refs = (x_ref, w0_ref, b0_ref, w1_ref, b1_ref, ..., o_ref)
      x_ref : [tm, D_in]           (f32)
      w_i   : [D_i, D_{i+1}]       (resident in VMEM across the grid)
      b_i   : [1,  D_{i+1}]
      o_ref : [tm, D_out_padded]   (lane-dense, padded to multiple of 128)
    """
    x_ref, o_ref = refs[0], refs[-1]
    wb_refs = refs[1:-1]

    h = x_ref[...]  # f32 activations, kept on-chip for the whole chain
    for i in range(num_layers):
        w = wb_refs[2 * i][...]
        b = wb_refs[2 * i + 1][...]
        # MXU matmul; optionally bf16 inputs (v6e/v7x), always f32 accumulate.
        y = jnp.dot(h.astype(compute_dtype), w.astype(compute_dtype),
                    preferred_element_type=jnp.float32)
        # Epilogue (bias add, sigmoid) stays in f32 — v5e-friendly.
        y = y + b
        if i == num_layers - 1:
            y = jax.nn.sigmoid(y)
        h = y
    o_ref[...] = h.astype(o_ref.dtype)


def mlp_forward(x, params, *, row_tile: int = 256,
                compute_dtype=jnp.float32):
    """x: [..., input_dim] -> [..., output_dim], single fused Pallas kernel.

    params: list of (w, b) with w: [in_dim, out_dim], b: [out_dim].
    compute_dtype: set to jnp.bfloat16 on v6e/v7x for large hidden dims
    (f32 accumulation is kept either way).
    """
    num_layers = len(params)
    lead_shape = x.shape[:-1]
    din = x.shape[-1]
    dout = params[-1][0].shape[1]

    xf = x.reshape(-1, din).astype(jnp.float32)
    n = xf.shape[0]

    # Row tile: multiple of 8 sublanes; pad N up to a whole number of tiles.
    # NOTE(v7x): with 64 MiB VMEM (half of v5e/v6e), shrink row_tile / raise
    # vmem_limit_bytes only if Din/Dout grow far beyond this configuration.
    tm = row_tile if n >= row_tile else _round_up(max(n, 1), 8)
    n_pad = _round_up(n, tm)
    if n_pad != n:
        xf = jnp.pad(xf, ((0, n_pad - n), (0, 0)))

    # Lane-dense final store: pad the last layer's output dim to 128 lanes
    # with zero weight/bias columns (sliced off after the call).
    dout_pad = _round_up(dout, 128)
    flat_inputs = [xf]
    in_specs = [pl.BlockSpec((tm, din), lambda i: (i, 0))]
    for li, (w, b) in enumerate(params):
        w_in, w_out = w.shape
        if li == num_layers - 1 and w_out != dout_pad:
            w = jnp.zeros((w_in, dout_pad), w.dtype).at[:, :w_out].set(w)
            b = jnp.zeros((dout_pad,), b.dtype).at[:w_out].set(b)
            w_out = dout_pad
        flat_inputs.append(w)
        flat_inputs.append(b.reshape(1, w_out))
        # Constant index_map -> weights/bias stay resident in VMEM, no re-DMA
        # across row-tile grid steps.
        in_specs.append(pl.BlockSpec((w_in, w_out), lambda i: (0, 0)))
        in_specs.append(pl.BlockSpec((1, w_out), lambda i: (0, 0)))

    kernel = functools.partial(_mlp_fused_kernel,
                               num_layers=num_layers,
                               compute_dtype=compute_dtype)

    out = pl.pallas_call(
        kernel,
        out_shape=jax.ShapeDtypeStruct((n_pad, dout_pad), jnp.float32),
        grid=(pl.cdiv(n_pad, tm),),
        in_specs=in_specs,
        out_specs=pl.BlockSpec((tm, dout_pad), lambda i: (i, 0)),
        compiler_params=pltpu.CompilerParams(
            dimension_semantics=("parallel",),
        ),
    )(*flat_inputs)

    out = out[:n, :dout]
    return out.reshape(*lead_shape, dout)


def init_mlp_params(key, input_dim, hidden_dim, output_dim, num_layers):
    """Deterministic init mimicking torch.nn.Linear (uniform +-1/sqrt(fan_in)).

    Weights are stored as [in_dim, out_dim] (transposed vs. PyTorch)."""
    h = [hidden_dim] * (num_layers - 1)
    dims_in = [input_dim] + h
    dims_out = h + [output_dim]
    params = []
    for din, dout in zip(dims_in, dims_out):
        key, kw, kb = jax.random.split(key, 3)
        bound = 1.0 / math.sqrt(din)
        w = jax.random.uniform(kw, (din, dout), jnp.float32, -bound, bound)
        b = jax.random.uniform(kb, (dout,), jnp.float32, -bound, bound)
        params.append((w, b))
    return params


def mlp_reference(x, params):
    """Pure-JAX reference for correctness check (matches PyTorch forward)."""
    xf = x.reshape(-1, x.shape[-1]).astype(jnp.float32)
    num_layers = len(params)
    for i, (w, b) in enumerate(params):
        xf = xf @ w + b
        if i == num_layers - 1:
            xf = jax.nn.sigmoid(xf)
    return xf.reshape(*x.shape[:-1], params[-1][0].shape[1])


if __name__ == "__main__":
    key = jax.random.PRNGKey(0)
    key_x, key_p = jax.random.split(key)

    # Small shapes consistent with the module: batch=2, seq=8, input_dim=32,
    # hidden_dim=64, output_dim=4, num_layers=3.
    batch, seq = 2, 8
    input_dim, hidden_dim, output_dim, num_layers = 32, 64, 4, 3

    x = jax.random.normal(key_x, (batch, seq, input_dim), jnp.float32)
    params = init_mlp_params(key_p, input_dim, hidden_dim, output_dim,
                             num_layers)

    out = mlp_forward(x, params)
    out = jax.block_until_ready(out)

    ref = mlp_reference(x, params)
    assert out.shape == (batch, seq, output_dim), out.shape
    assert jnp.allclose(out, ref, atol=1e-5, rtol=1e-5), "mismatch vs reference"

    print("KERNEL_OK")
</pallas_src>

<mosaic_0001>
module attributes {stable_mosaic.version = 11 : i64} {
  func.func @_mlp_fused_kernel(%arg0: i32, %arg1: memref<16x32xf32, #tpu.memory_space<vmem>>, %arg2: memref<32x64xf32, #tpu.memory_space<vmem>>, %arg3: memref<1x64xf32, #tpu.memory_space<vmem>>, %arg4: memref<64x64xf32, #tpu.memory_space<vmem>>, %arg5: memref<1x64xf32, #tpu.memory_space<vmem>>, %arg6: memref<64x128xf32, #tpu.memory_space<vmem>>, %arg7: memref<1x128xf32, #tpu.memory_space<vmem>>, %arg8: memref<16x128xf32, #tpu.memory_space<vmem>>) attributes {dimension_semantics = [#tpu.dimension_semantics<parallel>], iteration_bounds = array<i64: 1>, scalar_prefetch = 0 : i64, scratch_operands = 0 : i64, tpu.core_type = #tpu.core_type<tc>, window_params = [{transform_indices = @transform_0, window_bounds = array<i64: 16, 32>}, {pipeline_mode = #tpu.pipeline_mode<synchronous>, transform_indices = @transform_1, window_bounds = array<i64: 32, 64>}, {pipeline_mode = #tpu.pipeline_mode<synchronous>, transform_indices = @transform_2, window_bounds = array<i64: 1, 64>}, {pipeline_mode = #tpu.pipeline_mode<synchronous>, transform_indices = @transform_3, window_bounds = array<i64: 64, 64>}, {pipeline_mode = #tpu.pipeline_mode<synchronous>, transform_indices = @transform_4, window_bounds = array<i64: 1, 64>}, {pipeline_mode = #tpu.pipeline_mode<synchronous>, transform_indices = @transform_5, window_bounds = array<i64: 64, 128>}, {pipeline_mode = #tpu.pipeline_mode<synchronous>, transform_indices = @transform_6, window_bounds = array<i64: 1, 128>}, {transform_indices = @transform_7, window_bounds = array<i64: 16, 128>}]} {
    %c0 = arith.constant 0 : index
    %c0_0 = arith.constant 0 : index
    %0 = vector.load %arg1[%c0, %c0_0] : memref<16x32xf32, #tpu.memory_space<vmem>>, vector<16x32xf32>
    %c0_1 = arith.constant 0 : index
    %c0_2 = arith.constant 0 : index
    %1 = vector.load %arg2[%c0_1, %c0_2] : memref<32x64xf32, #tpu.memory_space<vmem>>, vector<32x64xf32>
    %c0_3 = arith.constant 0 : index
    %c0_4 = arith.constant 0 : index
    %2 = vector.load %arg3[%c0_3, %c0_4] : memref<1x64xf32, #tpu.memory_space<vmem>>, vector<1x64xf32>
    %cst = arith.constant dense<0.000000e+00> : vector<16x64xf32>
    %3 = tpu.matmul %0, %1, %cst {dimension_numbers = #tpu.dot_dimension_numbers<[1], [0], [0], [1], [0, 0, 1, 1], [], []>} : vector<16x32xf32>, vector<32x64xf32>, vector<16x64xf32> -> vector<16x64xf32>
    %4 = vector.broadcast %2 : vector<1x64xf32> to vector<16x64xf32>
    %5 = arith.addf %3, %4 : vector<16x64xf32>
    %c0_5 = arith.constant 0 : index
    %c0_6 = arith.constant 0 : index
    %6 = vector.load %arg4[%c0_5, %c0_6] : memref<64x64xf32, #tpu.memory_space<vmem>>, vector<64x64xf32>
    %c0_7 = arith.constant 0 : index
    %c0_8 = arith.constant 0 : index
    %7 = vector.load %arg5[%c0_7, %c0_8] : memref<1x64xf32, #tpu.memory_space<vmem>>, vector<1x64xf32>
    %cst_9 = arith.constant dense<0.000000e+00> : vector<16x64xf32>
    %8 = tpu.matmul %5, %6, %cst_9 {dimension_numbers = #tpu.dot_dimension_numbers<[1], [0], [0], [1], [0, 0, 1, 1], [], []>} : vector<16x64xf32>, vector<64x64xf32>, vector<16x64xf32> -> vector<16x64xf32>
    %9 = vector.broadcast %7 : vector<1x64xf32> to vector<16x64xf32>
    %10 = arith.addf %8, %9 : vector<16x64xf32>
    %c0_10 = arith.constant 0 : index
    %c0_11 = arith.constant 0 : index
    %11 = vector.load %arg6[%c0_10, %c0_11] : memref<64x128xf32, #tpu.memory_space<vmem>>, vector<64x128xf32>
    %c0_12 = arith.constant 0 : index
    %c0_13 = arith.constant 0 : index
    %12 = vector.load %arg7[%c0_12, %c0_13] : memref<1x128xf32, #tpu.memory_space<vmem>>, vector<1x128xf32>
    %cst_14 = arith.constant dense<0.000000e+00> : vector<16x128xf32>
    %13 = tpu.matmul %10, %11, %cst_14 {dimension_numbers = #tpu.dot_dimension_numbers<[1], [0], [0], [1], [0, 0, 1, 1], [], []>} : vector<16x64xf32>, vector<64x128xf32>, vector<16x128xf32> -> vector<16x128xf32>
    %14 = vector.broadcast %12 : vector<1x128xf32> to vector<16x128xf32>
    %15 = arith.addf %13, %14 : vector<16x128xf32>
    %16 = arith.negf %15 : vector<16x128xf32>
    %17 = math.exp %16 : vector<16x128xf32>
    %cst_15 = arith.constant 1.000000e+00 : f32
    %18 = vector.broadcast %cst_15 : f32 to vector<16x128xf32>
    %19 = arith.addf %18, %17 : vector<16x128xf32>
    %20 = arith.divf %18, %19 : vector<16x128xf32>
    %c0_16 = arith.constant 0 : index
    %c0_17 = arith.constant 0 : index
    %21 = vector.load %arg8[%c0_16, %c0_17] : memref<16x128xf32, #tpu.memory_space<vmem>>, vector<16x128xf32>
    tpu.vector_store %arg8[%c0_16, %c0_17], %20 {strides = array<i32>} : memref<16x128xf32, #tpu.memory_space<vmem>>, vector<16x128xf32>,
    return
  }
  func.func @transform_0(%arg0: i32) -> (i32, i32) {
    %c0_i32 = arith.constant 0 : i32
    %c0_i32_0 = arith.constant 0 : i32
    return %arg0, %c0_i32 : i32, i32
  }
  func.func @transform_1(%arg0: i32) -> (i32, i32) {
    %c0_i32 = arith.constant 0 : i32
    %c0_i32_0 = arith.constant 0 : i32
    %c0_i32_1 = arith.constant 0 : i32
    return %c0_i32, %c0_i32_0 : i32, i32
  }
  func.func @transform_2(%arg0: i32) -> (i32, i32) {
    %c0_i32 = arith.constant 0 : i32
    %c0_i32_0 = arith.constant 0 : i32
    %c0_i32_1 = arith.constant 0 : i32
    return %c0_i32, %c0_i32_0 : i32, i32
  }
  func.func @transform_3(%arg0: i32) -> (i32, i32) {
    %c0_i32 = arith.constant 0 : i32
    %c0_i32_0 = arith.constant 0 : i32
    %c0_i32_1 = arith.constant 0 : i32
    return %c0_i32, %c0_i32_0 : i32, i32
  }
  func.func @transform_4(%arg0: i32) -> (i32, i32) {
    %c0_i32 = arith.constant 0 : i32
    %c0_i32_0 = arith.constant 0 : i32
    %c0_i32_1 = arith.constant 0 : i32
    return %c0_i32, %c0_i32_0 : i32, i32
  }
  func.func @transform_5(%arg0: i32) -> (i32, i32) {
    %c0_i32 = arith.constant 0 : i32
    %c0_i32_0 = arith.constant 0 : i32
    %c0_i32_1 = arith.constant 0 : i32
    return %c0_i32, %c0_i32_0 : i32, i32
  }
  func.func @transform_6(%arg0: i32) -> (i32, i32) {
    %c0_i32 = arith.constant 0 : i32
    %c0_i32_0 = arith.constant 0 : i32
    %c0_i32_1 = arith.constant 0 : i32
    return %c0_i32, %c0_i32_0 : i32, i32
  }
  func.func @transform_7(%arg0: i32) -> (i32, i32) {
    %c0_i32 = arith.constant 0 : i32
    %c0_i32_0 = arith.constant 0 : i32
    return %arg0, %c0_i32 : i32, i32
  }
}

</mosaic_0001>

<bundles_post_ra>
// kernel: tpu_custom_call.1
= control target key start
LH: loop header
LB: loop body
LE: loop exit
PB: predicated region body
PF: predicated region fallthrough
CT: control target
= control target key end

     0   :  { %12 = vsyncpa [#allocation3], 0  ;;  %s704_s0 = inlined_call_operand.hbm [shape: f32[16,32], index: 0, kind: input, shape index: {}]   ;;  %s705_s1 = inlined_call_operand.hbm [shape: f32[32,64], index: 1, kind: input, shape index: {}]   ;;  %s706_s2 = inlined_call_operand.vmem [shape: f32[1,64], index: 2, kind: input, shape index: {}]   ;;  %s707_s3 = inlined_call_operand.hbm [shape: f32[64,64], index: 3, kind: input, shape index: {}]   ;;  %s708_s4 = inlined_call_operand.vmem [shape: f32[1,64], index: 4, kind: input, shape index: {}]   ;;  %s709_s5 = inlined_call_operand.hbm [shape: f32[64,128], index: 5, kind: input, shape index: {}]   ;;  %s710_s6 = inlined_call_operand.vmem [shape: f32[1,128], index: 6, kind: input, shape index: {}]   ;;  %s711_s7 = inlined_call_operand.hbm [shape: f32[16,128], index: 7, kind: output, shape index: {}]  }
   0x1   :  { %13 = vsyncpa [#allocation6], 0 }
   0x2   :  { %14 = vsyncpa [#allocation9], 0 }
   0x3   :  { %15 = vsyncpa [#allocation4], 0  ;;  %s612_s24 = smov [#allocation5]   ;;  %s613_s26 = smov [#allocation2]  }
   0x4   :  { %s33_s25 = sshll.u32 %s612_s24, 4  ;;  %s21_s27 = sshll.u32 %s613_s26, 4  ;;  %s34_s25 = int_to_ptr.vmem [resolvable:$true] %s33_s25  ;;  %s22_s27 = int_to_ptr.vmem [resolvable:$true] %s21_s27 }
   0x5   :  { %s512_s28 = scalar_lea.vmem %s34_s25, 512  ;;  %p517_p1 = scmp.lt.s32.totalorder %s34_s25, %s34_s25 }
   0x6   :  { %p513_p0 = scmp.ne.s32.totalorder %s34_s25, %s512_s28  ;;  %p518_p2 = scmp.lt.s32.totalorder %s512_s28, %s512_s28 }
   0x8   :  { %p519_p3 = por %p518_p2, %p517_p1 }
   0xa   :  { %p520_p4 = pnand %p519_p3, %p513_p0 }
   0xc   :  { %523 = shalt.err (!%p520_p4)
}
   0xd   :  { %s614_s29 = smov 128   ;;  %s615_s30 = smov 8  }
   0xe   :  { %39 = dma.hbm_to_vmem [thread:$0]  %s705_s1, 512, %s34_s25, [#allocation6], %s614_s29, %s614_s29, %s615_s30  }
   0xf   :  { %s532_s10 = scalar_lea.vmem %s22_s27, 256  ;;  %p537_p6 = scmp.lt.s32.totalorder %s22_s27, %s22_s27 }
  0x10   :  { %p533_p5 = scmp.ne.s32.totalorder %s22_s27, %s532_s10  ;;  %p538_p7 = scmp.lt.s32.totalorder %s532_s10, %s532_s10 }
  0x12   :  { %p539_p8 = por %p538_p7, %p537_p6 }
  0x14   :  { %p540_p9 = pnand %p539_p8, %p533_p5 }
  0x16   :  { %543 = shalt.err (!%p540_p9)
}
  0x17   :  { %27 = dma.hbm_to_vmem [thread:$0]  %s704_s0, 256, %s22_s27, [#allocation3], %s614_s29, %s614_s29, %s615_s30  }
  0x18   :  { %s616_s13 = smov [#allocation7]   ;;  %s617_s15 = smov [#allocation8]  }
  0x19   :  { %s47_s14 = sshll.u32 %s616_s13, 4  ;;  %s61_s16 = sshll.u32 %s617_s15, 4  ;;  %s48_s14 = int_to_ptr.vmem [resolvable:$true] %s47_s14  ;;  %s62_s16 = int_to_ptr.vmem [resolvable:$true] %s61_s16 }
  0x1a   :  { %s552_s1 = scalar_lea.vmem %s48_s14, 1024  ;;  %p557_p11 = scmp.lt.s32.totalorder %s48_s14, %s48_s14 }
  0x1b   :  { %p553_p10 = scmp.ne.s32.totalorder %s48_s14, %s552_s1  ;;  %p558_p12 = scmp.lt.s32.totalorder %s552_s1, %s552_s1 }
  0x1d   :  { %p559_p13 = por %p558_p12, %p557_p11 }
  0x1f   :  { %p560_p0 = pnand %p559_p13, %p553_p10 }
  0x21   :  { %563 = shalt.err (!%p560_p0)
}
  0x22   :  { %53 = dma.hbm_to_vmem [thread:$0]  %s707_s3, 1024, %s48_s14, [#allocation6], %s614_s29, %s614_s29, %s615_s30  }
  0x23   :  { %s572_s0 = scalar_lea.vmem %s62_s16, 1024  ;;  %p577_p2 = scmp.lt.s32.totalorder %s62_s16, %s62_s16 }
  0x24   :  { %p573_p1 = scmp.ne.s32.totalorder %s62_s16, %s572_s0  ;;  %p578_p3 = scmp.lt.s32.totalorder %s572_s0, %s572_s0 }
  0x26   :  { %p579_p4 = por %p578_p3, %p577_p2 }
  0x28   :  { %p580_p5 = pnand %p579_p4, %p573_p1 }
  0x2a   :  { %583 = shalt.err (!%p580_p5)
}
  0x2b   :  { %67 = dma.hbm_to_vmem [thread:$0]  %s709_s5, 1024, %s62_s16, [#allocation9], %s614_s29, %s614_s29, %s615_s30  }
  0x2c   :  { %604 = dma.done.wait [#allocation3], 256  }
  0x2d   :  { %605 = vsyncadd [#allocation3], 4294967040 }
  0x2e   :  { %606 = dma.done.wait [#allocation6], 1536  }
  0x2f   :  { %607 = vsyncadd [#allocation6], 4294965760 }
  0x30   :  { %608 = dma.done.wait [#allocation9], 1024  }
  0x31   :  { %609 = vsyncadd [#allocation9], 4294966272  ;;  %vm95_vm0 = vcmask 261120   ;;  %v87_v0 = vld [vmem:[#allocation5 + $0x18] sm:$0xff]  ;;  %v86_v1 = vld [vmem:[#allocation5 + $0x10] sm:$0xff]  ;;  %vm192_vm1 = vcmask 523264  }
  0x32   :  { %440 = vmatprep.subr.mxu0 %v87_v0  ;;  %v82_v2 = vld [vmem:[#allocation2] sm:$0xff]  ;;  %v85_v3 = vld [vmem:[#allocation5 + $0x8] sm:$0xff]  ;;  %v184_v4 = vld [vmem:[#allocation7 + $0x38] sm:$0xff] }
  0x33   :  { %441 = vmatpush3.msra.mxu0 %v87_v0  ;;  %448 = vmatprep.mubr.msk.f32.mxu0 %vm95_vm0, %v82_v2  ;;  %v183_v5 = vld [vmem:[#allocation7 + $0x30] sm:$0xff]  ;;  %v84_v6 = vld [vmem:[#allocation5] sm:$0xff]  ;;  %v182_v7 = vld [vmem:[#allocation7 + $0x28] sm:$0xff] }
  0x34   :  { %442 = vmatprep.subr.mxu0 %v86_v1  ;;  %451 = vmatprep.subr.mxu1 %v184_v4  ;;  %v83_v8 = vld [vmem:[#allocation2 + $0x8] sm:$0xff]  ;;  %v181_v9 = vld [vmem:[#allocation7 + $0x20] sm:$0xff]  ;;  %v179_v11 = vld [vmem:[#allocation7 + $0x10] sm:$0xff] }
  0x35   :  { %443 = vmatpush3.msra.mxu0 %v86_v1  ;;  %452 = vmatpush3.msra.mxu1 %v184_v4  ;;  %v180_v10 = vld [vmem:[#allocation7 + $0x18] sm:$0xff]  ;;  %v178_v12 = vld [vmem:[#allocation7 + $0x8] sm:$0xff]  ;;  %v177_v13 = vld [vmem:[#allocation7] sm:$0xff] }
  0x36   :  { %444 = vmatprep.subr.mxu0 %v85_v3  ;;  %453 = vmatprep.subr.mxu1 %v183_v5  ;;  %v281_v14 = vld [vmem:[#allocation8 + $0x38] sm:$0xff]  ;;  %v280_v15 = vld [vmem:[#allocation8 + $0x30] sm:$0xff]  ;;  %v279_v16 = vld [vmem:[#allocation8 + $0x28] sm:$0xff] }
  0x37   :  { %445 = vmatpush3.msra.mxu0 %v85_v3  ;;  %454 = vmatpush3.msra.mxu1 %v183_v5  ;;  %v278_v17 = vld [vmem:[#allocation8 + $0x20] sm:$0xff]  ;;  %v277_v18 = vld [vmem:[#allocation8 + $0x18] sm:$0xff]  ;;  %v403_v20 = vld [vmem:[%s706_s2] ss:$0 sm:$0xff] }
  0x38   :  { %446 = vmatprep.subr.mxu0 %v84_v6  ;;  %455 = vmatprep.subr.mxu1 %v182_v7  ;;  %v276_v24 = vld [vmem:[#allocation8 + $0x10] sm:$0xff]  ;;  %v275_v25 = vld [vmem:[#allocation8 + $0x8] sm:$0xff]  ;;  %v274_v26 = vld [vmem:[#allocation8] sm:$0xff] }
  0x39   :  { %447 = vmatpush3.msra.mxu0 %v84_v6  ;;  %456 = vmatpush3.msra.mxu1 %v182_v7  ;;  %v406_v28 = vld [vmem:[%s708_s4] ss:$0 sm:$0xff]  ;;  %s618_s4 = smov [#allocation10]  }
  0x3a   :  { %449 = vmatmul.mubr.msk.f32.vlgmr.msra.gmra.mxu0 %vm95_vm0, %v83_v8  ;;  %457 = vmatprep.subr.mxu1 %v181_v9  ;;  %v409_v32 = vld [vmem:[%s710_s6] ss:$0 sm:$0xff]  ;;  %s389_s24 = sshll.u32 %s618_s4, 4  ;;  %s390_s24 = int_to_ptr.vmem [resolvable:$true] %s389_s24 }
  0x3b   :  { %458 = vmatpush3.msra.mxu1 %v181_v9  ;;  %470 = vmatprep.subr.mxu0 %v281_v14  ;;  %s584_s6 = scalar_lea.vmem %s390_s24, 256  ;;  %p589_p7 = scmp.lt.s32.totalorder %s390_s24, %s390_s24 }
  0x3c   :  { %459 = vmatprep.subr.mxu1 %v180_v10  ;;  %471 = vmatpush3.msra.mxu0 %v281_v14  ;;  %p585_p6 = scmp.ne.s32.totalorder %s390_s24, %s584_s6  ;;  %p590_p8 = scmp.lt.s32.totalorder %s584_s6, %s584_s6 }
  0x3d   :  { %460 = vmatpush3.msra.mxu1 %v180_v10  ;;  %472 = vmatprep.subr.mxu0 %v280_v15 }
  0x3e   :  { %461 = vmatprep.subr.mxu1 %v179_v11  ;;  %473 = vmatpush3.msra.mxu0 %v280_v15  ;;  %p591_p9 = por %p590_p8, %p589_p7 }
  0x3f   :  { %462 = vmatpush3.msra.mxu1 %v179_v11  ;;  %474 = vmatprep.subr.mxu0 %v279_v16 }
  0x40   :  { %463 = vmatprep.subr.mxu1 %v178_v12  ;;  %475 = vmatpush3.msra.mxu0 %v279_v16  ;;  %p592_p10 = pnand %p591_p9, %p585_p6 }
  0x41   :  { %464 = vmatpush3.msra.mxu1 %v178_v12  ;;  %476 = vmatprep.subr.mxu0 %v278_v17 }
  0x42   :  { %465 = vmatprep.subr.mxu1 %v177_v13  ;;  %477 = vmatpush3.msra.mxu0 %v278_v17 }
  0x43   :  { %466 = vmatpush3.msra.mxu1 %v177_v13  ;;  %478 = vmatprep.subr.mxu0 %v277_v18 }
  0x44   :  { %479 = vmatpush3.msra.mxu0 %v277_v18 }
  0x45   :  { %480 = vmatprep.subr.mxu0 %v276_v24 }
  0x46   :  { %481 = vmatpush3.msra.mxu0 %v276_v24 }
  0x47   :  { %482 = vmatprep.subr.mxu0 %v275_v25 }
  0x48   :  { %483 = vmatpush3.msra.mxu0 %v275_v25 }
  0x49   :  { %484 = vmatprep.subr.mxu0 %v274_v26 }
  0x4a   :  { %485 = vmatpush3.msra.mxu0 %v274_v26 }
  0xfa   :  { %v450_v19 = vpop.f32.mrf.mxu0 }
  0xfb   :  { %v174_v23 = vadd.f32 %v450_v19, %v403_v20 }
  0xfc   :  { %v168_v21 = vpop.f32.mrf.mxu0 }
  0xfd   :  { %v169_v22 = vadd.f32 %v403_v20, %v168_v21 }
  0xff   :  { %467 = vmatprep.mubr.msk.f32.mxu1 %vm192_vm1, %v169_v22 }
 0x100   :  { %468 = vmatmul.mubr.msk.f32.vlgmr.msra.gmra.mxu1 %vm192_vm1, %v174_v23 }
 0x1c0   :  { %v469_v27 = vpop.f32.mrf.mxu1 }
 0x1c1   :  { %v271_v31 = vadd.f32 %v469_v27, %v406_v28 }
 0x1c2   :  { %v265_v29 = vpop.f32.mrf.mxu1 }
 0x1c3   :  { %v266_v30 = vadd.f32 %v406_v28, %v265_v29 }
 0x1c5   :  { %486 = vmatprep.mubr.msk.f32.mxu0 %vm192_vm1, %v266_v30 }
 0x1c6   :  { %487 = vmatmul.mubr.msk.f32.vlgmr.msra.gmra.mxu0 %vm192_vm1, %v271_v31 }
 0x286   :  { %v488_v33 = vpop.f32.mrf.mxu0 }
 0x287   :  { %v367_v34 = vadd.f32 %v488_v33, %v409_v32 }
 0x288   :  { %v361_v35 = vpop.f32.mrf.mxu0 }
 0x289   :  { %v413_v36 = vmul.f32 -1.442695, %v367_v34  ;;  %v362_v37 = vadd.f32 %v409_v32, %v361_v35 }
 0x28b   :  { %496 = vpow2.f32 %v413_v36  ;;  %v412_v38 = vmul.f32 -1.442695, %v362_v37 }
 0x28d   :  { %498 = vpow2.f32 %v412_v38 }
 0x298   :  { %v497_v39 = vpop.eup %496 }
 0x299   :  { %v377_v40 = vadd.f32 1.0, %v497_v39 }
 0x29a   :  { %v499_v41 = vpop.eup %498 }
 0x29b   :  { %500 = vrcp.f32 %v377_v40  ;;  %v376_v42 = vadd.f32 1.0, %v499_v41 }
 0x29d   :  { %502 = vrcp.f32 %v376_v42 }
 0x2a8   :  { %v501_v43 = vpop.eup %500 }
 0x2a9   :  { %383 = vst [vmem:[#allocation10 + $0x8] sm:$0xff] %v501_v43 }
 0x2aa   :  { %v503_v44 = vpop.eup %502 }
 0x2ab   :  { %382 = vst [vmem:[#allocation10] sm:$0xff] %v503_v44 }
 0x2ac   :  { %595 = shalt.err (!%p592_p10)
}
 0x2ad   :  { %395 = dma.vmem_to_hbm [thread:$0]  %s390_s24, 256, %s711_s7, [#allocation4], %s614_s29, %s614_s29, %s615_s30  }
 0x2ae   :  { %610 = dma.done.wait [#allocation4], 256  }
 0x2af   :  { %611 = vsyncadd [#allocation4], 4294967040 }
 0x2b0   :  { %399 = vsyncpa [#allocation3], 1 }
 0x2b1   :  { %400 = vsyncpa [#allocation6], 1 }
 0x2b2   :  { %401 = vsyncpa [#allocation9], 1 }
 0x2b3   :  { %402 = vsyncpa [#allocation4], 1 }

</bundles_post_ra>
